<compile_context>
chip_gen: v6e
topology: v6e:2x2x1
jax: 0.10.0
libtpu: 0.0.40
codegen_flags: <defaults>
</compile_context>

<pallas_src>
import jax
import jax.numpy as jnp
import numpy as np
from jax.experimental import pallas as pl
from jax.experimental.pallas import tpu as pltpu


def _round_up(a: int, m: int) -> int:
    return (a + m - 1) // m * m


def _cdiv(a: int, b: int) -> int:
    return (a + b - 1) // b


def _interp_matrix_np(out_size: int, in_size: int) -> np.ndarray:
    """Linear-interp matrix (out_size, in_size), align_corners=True, float64."""
    A = np.zeros((out_size, in_size), dtype=np.float64)
    if out_size == 1 or in_size == 1:
        A[:, 0] = 1.0
        return A
    o = np.arange(out_size, dtype=np.float64)
    src = o * (in_size - 1) / (out_size - 1)
    i0 = np.clip(np.floor(src).astype(np.int64), 0, in_size - 1)
    i1 = np.clip(i0 + 1, 0, in_size - 1)
    frac = src - i0
    A[np.arange(out_size), i0] += 1.0 - frac
    A[np.arange(out_size), i1] += frac
    return A


def _vmem_budgets() -> tuple:
    """(scoped vmem limit handed to Mosaic, budget for pipelined blocks), per chip gen."""
    phys = 64 * 1024 * 1024  # conservative default = v7x per-TensorCore VMEM
    try:
        phys = int(pltpu.get_tpu_info().vmem_capacity_bytes)
    except Exception:
        pass
    vmem_limit = min(phys * 3 // 4, 96 * 1024 * 1024)     # 96 MiB (v5e/v6e) / 48 MiB (v7x)
    block_budget = min(phys * 3 // 8, 48 * 1024 * 1024)   # 48 MiB (v5e/v6e) / 24 MiB (v7x)
    return vmem_limit, block_budget


def _pick_tb(B: int, per_plane_bytes: int, resident_bytes: int, budget: int) -> int:
    """Planes per grid step: multiple of 8, fits the VMEM budget, >=2 steps when possible."""
    avail = max(budget - resident_bytes, 8 * per_plane_bytes)
    tb_cap = max(8, (avail // max(per_plane_bytes, 1)) // 8 * 8)
    if B <= 8:
        return 8
    # Aim for >= 2 grid steps so ("parallel",) can shard the batch over v7x's 2 TensorCores.
    tb_split = _round_up(_cdiv(B, 2), 8)
    return max(8, min(tb_cap, tb_split))


# ----------------------------------------------------------------------------- kernels


def _kron_kernel(ak_ref, x_ref, o_ref):
    # ak_ref: (H*W, H_out*W_out)  resident Kronecker interpolation matrix
    # x_ref : (TB, H*W)           TB flattened input planes (lane-dense)
    # o_ref : (TB, H_out*W_out)   TB flattened output planes (lane-dense)
    o_ref[...] = jnp.dot(
        x_ref[...], ak_ref[...], preferred_element_type=jnp.float32
    ).astype(o_ref.dtype)


def _make_two_matmul_kernel(TB: int, H: int, W: int, H_out: int, W_out: int):
    reshape_ok = (H_out % 8) == 0  # collapsing (TB, H_out) onto sublanes is layout-free

    def kernel(ah_ref, awt_ref, x_ref, o_ref):
        # ah_ref : (H_out, H), awt_ref : (W, W_out)  (resident)
        # x_ref  : (TB, H, W), o_ref : (TB, H_out, W_out)
        x = x_ref[...]
        ah = ah_ref[...]
        awt = awt_ref[...]
        # H-interp as a batched MXU matmul.  Mosaic's dot_general requires matching batch
        # dims, so ah is broadcast in the operand dtype (accounted for in the VMEM model).
        ah_b = jnp.broadcast_to(ah[None], (TB, H_out, H))
        t = jnp.einsum("boh,bhw->bow", ah_b, x, preferred_element_type=jnp.float32)
        if reshape_ok:
            out = jnp.dot(
                t.reshape(TB * H_out, W), awt, preferred_element_type=jnp.float32
            ).reshape(TB, H_out, W_out)
        else:
            awt_b = jnp.broadcast_to(awt[None], (TB, W, W_out))
            out = jnp.einsum("bow,bwt->bot", t, awt_b, preferred_element_type=jnp.float32)
        o_ref[...] = out.astype(o_ref.dtype)

    return kernel


# ----------------------------------------------------------------------------- wrapper


def up_2(x: jnp.ndarray) -> jnp.ndarray:
    """Equivalent of Up_2.forward: trilinear upsample (1, 2, 2), align_corners=True."""
    orig_dtype = x.dtype
    if x.dtype not in (jnp.float32, jnp.bfloat16):
        x = x.astype(jnp.float32)
    op_dtype = x.dtype
    itemsize = jnp.dtype(op_dtype).itemsize

    N, C, D, H, W = x.shape
    H_out, W_out = 2 * H, 2 * W
    B = N * C * D
    HW, HWo = H * W, H_out * W_out

    A_h = _interp_matrix_np(H_out, H)   # (H_out, H) float64
    A_w = _interp_matrix_np(W_out, W)   # (W_out, W) float64

    vmem_limit, block_budget = _vmem_budgets()

    # Path selection: fused Kronecker matmul whenever the plane is lane-sparse and the
    # Kronecker matrix comfortably fits VMEM; otherwise the two-matmul structure.
    kron_bytes = itemsize * _round_up(HW, 8) * _round_up(HWo, 128)
    use_kron = (W < 128 or W_out < 128) and kron_bytes <= 4 * 1024 * 1024

    if use_kron:
        ak = jnp.asarray(np.kron(A_h, A_w).T, dtype=op_dtype)   # (H*W, H_out*W_out)
        x_flat = x.reshape(B, HW)

        hw_p = _round_up(HW, 128)
        hwo_p = _round_up(HWo, 128)
        per_plane = (2 * itemsize * hw_p        # input block, double-buffered
                     + 2 * itemsize * hwo_p     # output block, double-buffered
                     + 4 * hwo_p)               # f32 matmul result before the cast
        resident = 2 * kron_bytes
        TB = _pick_tb(B, per_plane, resident, block_budget)
        B_pad = _round_up(B, TB)
        if B_pad != B:
            x_flat = jnp.pad(x_flat, ((0, B_pad - B), (0, 0)))
        grid = (B_pad // TB,)

        cost = pl.CostEstimate(
            flops=2 * B_pad * HW * HWo,
            transcendentals=0,
            bytes_accessed=itemsize * (B_pad * HW + B_pad * HWo + HW * HWo),
        )
        out_flat = pl.pallas_call(
            _kron_kernel,
            out_shape=jax.ShapeDtypeStruct((B_pad, HWo), op_dtype),
            grid_spec=pltpu.PrefetchScalarGridSpec(
                num_scalar_prefetch=0,
                grid=grid,
                in_specs=[
                    pl.BlockSpec((HW, HWo), lambda b: (0, 0)),   # Kron matrix (resident)
                    pl.BlockSpec((TB, HW), lambda b: (b, 0)),    # TB planes per step
                ],
                out_specs=pl.BlockSpec((TB, HWo), lambda b: (b, 0)),
            ),
            compiler_params=pltpu.CompilerParams(
                dimension_semantics=("parallel",),
                vmem_limit_bytes=vmem_limit,
            ),
            cost_estimate=cost,
        )(ak, x_flat)
        out = out_flat[:B].reshape(N, C, D, H_out, W_out)
    else:
        ah = jnp.asarray(A_h, dtype=op_dtype)      # (H_out, H)
        awt = jnp.asarray(A_w.T, dtype=op_dtype)   # (W, W_out)
        x_flat = x.reshape(B, H, W)

        Hp, Wp = _round_up(H, 8), _round_up(W, 128)
        Hop, Wop = _round_up(H_out, 8), _round_up(W_out, 128)
        Hl = _round_up(H, 128)
        per_plane = (2 * itemsize * Hp * Wp        # input block, double-buffered
                     + itemsize * Hop * Hl         # broadcast A_h (operand dtype)
                     + 4 * Hop * Wp                # f32 H-interp intermediate
                     + 2 * itemsize * Hop * Wop    # output block, double-buffered
                     + 4 * Hop * Wop)              # f32 W-interp result before the cast
        resident = 4 * itemsize * (Hop * Hl + _round_up(W, 8) * Wop)
        TB = _pick_tb(B, per_plane, resident, block_budget)
        B_pad = _round_up(B, TB)
        if B_pad != B:
            x_flat = jnp.pad(x_flat, ((0, B_pad - B), (0, 0), (0, 0)))
        grid = (B_pad // TB,)

        cost = pl.CostEstimate(
            flops=2 * B_pad * H_out * W * (H + W_out),
            transcendentals=0,
            bytes_accessed=itemsize * (B_pad * H * W + B_pad * HWo + H_out * H + W * W_out),
        )
        out3 = pl.pallas_call(
            _make_two_matmul_kernel(TB, H, W, H_out, W_out),
            out_shape=jax.ShapeDtypeStruct((B_pad, H_out, W_out), op_dtype),
            grid_spec=pltpu.PrefetchScalarGridSpec(
                num_scalar_prefetch=0,
                grid=grid,
                in_specs=[
                    pl.BlockSpec((H_out, H), lambda b: (0, 0)),     # A_h   (resident)
                    pl.BlockSpec((W, W_out), lambda b: (0, 0)),     # A_w^T (resident)
                    pl.BlockSpec((TB, H, W), lambda b: (b, 0, 0)),  # TB planes per step
                ],
                out_specs=pl.BlockSpec((TB, H_out, W_out), lambda b: (b, 0, 0)),
            ),
            compiler_params=pltpu.CompilerParams(
                dimension_semantics=("parallel",),
                vmem_limit_bytes=vmem_limit,
            ),
            cost_estimate=cost,
        )(ah, awt, x_flat)
        out = out3[:B].reshape(N, C, D, H_out, W_out)

    return out.astype(orig_dtype)


# ----------------------------------------------------------------------------- reference


def _reference_up_2(x: np.ndarray) -> np.ndarray:
    """Pure-numpy reference reproducing torch trilinear (1,2,2), align_corners=True."""
    N, C, D, H, W = x.shape
    H_out, W_out = 2 * H, 2 * W
    out = np.zeros((N, C, D, H_out, W_out), dtype=np.float64)

    def src_coords(out_size, in_size):
        if out_size == 1 or in_size == 1:
            z = np.zeros(out_size, dtype=np.int64)
            return z, z, np.zeros(out_size)
        o = np.arange(out_size, dtype=np.float64)
        s = o * (in_size - 1) / (out_size - 1)
        i0 = np.clip(np.floor(s).astype(np.int64), 0, in_size - 1)
        i1 = np.clip(i0 + 1, 0, in_size - 1)
        return i0, i1, s - i0

    h0, h1, hf = src_coords(H_out, H)
    w0, w1, wf = src_coords(W_out, W)
    xd = x.astype(np.float64)
    for ho in range(H_out):
        for wo in range(W_out):
            out[..., ho, wo] = (
                xd[..., h0[ho], w0[wo]] * (1 - hf[ho]) * (1 - wf[wo])
                + xd[..., h0[ho], w1[wo]] * (1 - hf[ho]) * wf[wo]
                + xd[..., h1[ho], w0[wo]] * hf[ho] * (1 - wf[wo])
                + xd[..., h1[ho], w1[wo]] * hf[ho] * wf[wo]
            )
    return out.astype(x.dtype)


if __name__ == "__main__":
    key = jax.random.PRNGKey(0)
    k1, k2, k3 = jax.random.split(key, 3)

    # Test 1: Kronecker path, B = 24 planes (>= 2 grid steps for v7x megacore).
    N, C, D, H, W = 2, 3, 4, 8, 16
    x1 = jax.random.normal(k1, (N, C, D, H, W), dtype=jnp.float32)
    y1 = jax.block_until_ready(up_2(x1))
    assert y1.shape == (N, C, D, 2 * H, 2 * W), y1.shape
    np.testing.assert_allclose(np.asarray(y1), _reference_up_2(np.asarray(x1)),
                               rtol=1e-5, atol=1e-5)

    # Test 2: Kronecker path, B = 6 (not a multiple of 8) -> plane-padding path.
    x2 = jax.random.normal(k2, (1, 2, 3, 8, 8), dtype=jnp.float32)
    y2 = jax.block_until_ready(up_2(x2))
    assert y2.shape == (1, 2, 3, 16, 16), y2.shape
    np.testing.assert_allclose(np.asarray(y2), _reference_up_2(np.asarray(x2)),
                               rtol=1e-5, atol=1e-5)

    # Test 3: two-matmul path (Kronecker matrix too large), lane-dense W_out = 128.
    x3 = jax.random.normal(k3, (1, 1, 2, 16, 64), dtype=jnp.float32)
    y3 = jax.block_until_ready(up_2(x3))
    assert y3.shape == (1, 1, 2, 32, 128), y3.shape
    np.testing.assert_allclose(np.asarray(y3), _reference_up_2(np.asarray(x3)),
                               rtol=1e-5, atol=1e-5)

    print("KERNEL_OK")
</pallas_src>

<mosaic_0001>
module attributes {stable_mosaic.version = 11 : i64} {
  func.func @_kron_kernel(%arg0: i32, %arg1: memref<128x512xf32, #tpu.memory_space<vmem>>, %arg2: memref<16x128xf32, #tpu.memory_space<vmem>>, %arg3: memref<16x512xf32, #tpu.memory_space<vmem>>) attributes {dimension_semantics = [#tpu.dimension_semantics<parallel>], iteration_bounds = array<i64: 2>, scalar_prefetch = 0 : i64, scratch_operands = 0 : i64, tpu.core_type = #tpu.core_type<tc>, window_params = [{pipeline_mode = #tpu.pipeline_mode<synchronous>, transform_indices = @transform_0, window_bounds = array<i64: 128, 512>}, {transform_indices = @transform_1, window_bounds = array<i64: 16, 128>}, {transform_indices = @transform_2, window_bounds = array<i64: 16, 512>}]} {
    %c0 = arith.constant 0 : index
    %c0_0 = arith.constant 0 : index
    %0 = vector.load %arg2[%c0, %c0_0] : memref<16x128xf32, #tpu.memory_space<vmem>>, vector<16x128xf32>
    %c0_1 = arith.constant 0 : index
    %c0_2 = arith.constant 0 : index
    %1 = vector.load %arg1[%c0_1, %c0_2] : memref<128x512xf32, #tpu.memory_space<vmem>>, vector<128x512xf32>
    %cst = arith.constant dense<0.000000e+00> : vector<16x512xf32>
    %2 = tpu.matmul %0, %1, %cst {dimension_numbers = #tpu.dot_dimension_numbers<[1], [0], [0], [1], [0, 0, 1, 1], [], []>} : vector<16x128xf32>, vector<128x512xf32>, vector<16x512xf32> -> vector<16x512xf32>
    %c0_3 = arith.constant 0 : index
    %c0_4 = arith.constant 0 : index
    %3 = vector.load %arg3[%c0_3, %c0_4] : memref<16x512xf32, #tpu.memory_space<vmem>>, vector<16x512xf32>
    tpu.vector_store %arg3[%c0_3, %c0_4], %2 {strides = array<i32>} : memref<16x512xf32, #tpu.memory_space<vmem>>, vector<16x512xf32>,
    return
  }
  func.func @transform_0(%arg0: i32) -> (i32, i32) {
    %c0_i32 = arith.constant 0 : i32
    %c0_i32_0 = arith.constant 0 : i32
    %c0_i32_1 = arith.constant 0 : i32
    return %c0_i32, %c0_i32_0 : i32, i32
  }
  func.func @transform_1(%arg0: i32) -> (i32, i32) {
    %c0_i32 = arith.constant 0 : i32
    %c0_i32_0 = arith.constant 0 : i32
    return %arg0, %c0_i32 : i32, i32
  }
  func.func @transform_2(%arg0: i32) -> (i32, i32) {
    %c0_i32 = arith.constant 0 : i32
    %c0_i32_0 = arith.constant 0 : i32
    return %arg0, %c0_i32 : i32, i32
  }
}

</mosaic_0001>

<bundles_post_ra>
// kernel: tpu_custom_call.1
= control target key start
LH: loop header
LB: loop body
LE: loop exit
PB: predicated region body
PF: predicated region fallthrough
CT: control target
= control target key end

     0   :  { %7 = vsyncpa [#allocation3], 0  ;;  %s926_s0 = inlined_call_operand.hbm [shape: f32[128,512], index: 0, kind: input, shape index: {}]   ;;  %s927_s1 = inlined_call_operand.hbm [shape: f32[32,128], index: 1, kind: input, shape index: {}]   ;;  %s928_s2 = inlined_call_operand.hbm [shape: f32[32,512], index: 2, kind: output, shape index: {}]  }
   0x1   :  { %8 = vsyncpa [#allocation6], 0 }
   0x2   :  { %10 = vsyncpa [#allocation6 + $0x1], 0 }
   0x3   :  { %11 = vsyncpa [#allocation4], 0 }
   0x4   :  { %13 = vsyncpa [#allocation4 + $0x1], 0  ;;  %s740_s9 = smov 0   ;;  %s742_s10 = smov 0  }
   0x5   :  { %s744_s11 = smov 0   ;;  %s746_s12 = smov 0  }
   0x6 LB: > { %s761_s13 = sadd.s32 4294967295, %s713_s12   ;;  %s507_s14 = sadd.s32 4294967294, %s713_s12   ;;  %s713_s12 = sphi %s746_s12, %s950_s12   ;;  %s709_s11 = sphi %s744_s11, %s949_s11   ;;  %s705_s10 = sphi %s742_s10, %s948_s10   ;;  %s701_s9 = sphi %s740_s9, %s947_s9  }
   0x7   : > { %p60_p0 = scmp.ne.s32.totalorder %s705_s10, %s701_s9  ;;  %p929_p1 = scmp.eq.s32.totalorder %s761_s13, 0 }
   0x8   : > { %p90_p3 = scmp.eq.s32.totalorder %s507_s14, 1  ;;  %p508_p5 = scmp.ge.s32.totalorder %s713_s12, 1 }
   0x9   : > { %p770_p4 = por %p929_p1, %p60_p0  ;;  %p97_p7 = scmp.lt.s32.totalorder %s713_s12, 3 }
   0xa   : > { %p775_p6 = por %p90_p3, %p60_p0  ;;  %s715_s18 = smov [#allocation2]  }
   0xb   : > { %s933_s15 = scalar_select %p770_p4, 1, 0 }
   0xc   : > { %s934_s16 = scalar_select %p775_p6, 1, 0 }
   0xd   : > { %p780_p8 = pnand %p508_p5, %p97_p7  ;;  %s109_s19 = sshll.u32 %s715_s18, 4  ;;  %s110_s19 = int_to_ptr.vmem [resolvable:$true] %s109_s19 }
   0xe   : > { %s794_s21 = sadd.s32 1, %s713_s12   ;;  %s47_s22 = sadd.s32 1, %s709_s11 }
   0xf   : > { %s935_s17 = scalar_select %p780_p8, 1, 0 }
  0x10   : > { %p535_p9 = pneg %p780_p8  ;;  %s44_s23 = ssub.s32 %s713_s12, %s794_s21 }
  0x11   : > { %s602_s24 = scalar_lea.vmem %s110_s19, 8192  ;;  %p610_p5 = scmp.lt.s32.totalorder %s110_s19, %s110_s19 }
  0x12   : > { %p789_p11 = pnand %p535_p9, %p929_p1  ;;  %p603_p13 = scmp.ne.s32.totalorder %s110_s19, %s602_s24 }
  0x13   : > { %p611_p7 = scmp.lt.s32.totalorder %s602_s24, %s602_s24 }
  0x14   : > { %p593_p12 = pneg %p789_p11 }
  0x15   : > { %p612_p10 = por %p611_p7, %p610_p5 }
  0x16   : > { %p605_p0 = pnand %p603_p13, %p593_p12 }
  0x18   : > { %p606_p3 = pneg %p605_p0 }
  0x1a   : > { %p613_p2 = pnand %p612_p10, %p606_p3 }
  0x1c   : > { %616 = shalt.err (!%p613_p2)
}
  0x1d   : > { %s716_s25 = smov 512   ;;  %s717_s26 = smov 32  }
  0x1e   : > { %538 = dma.hbm_to_vmem [thread:$0]  (!%p789_p11), %s926_s0, 8192, %s110_s19, [#allocation3], %s716_s25, %s716_s25, %s717_s26  }
  0x1f   : > { %p45_p9 = scmp.eq.s32.totalorder %s44_s23, 0  ;;  %p54_p12 = scmp.ne.s32.totalorder %s709_s11, %s705_s10 }
  0x20   : > { %p55_p10 = scmp.eq.s32.totalorder %s713_s12, 0  ;;  %p548_p2 = scmp.lt.s32.totalorder %s713_s12, 2 }
  0x21   : > { %s811_s29 = scalar_select %p45_p9, %s709_s11, %s47_s22  }
  0x22   : > { %p56_p13 = por %p55_p10, %p54_p12  ;;  %p937_p0 = scmp.eq.s32.totalorder %s761_s13, 1 }
  0x23   : > { %s123_s3 = sand.u32 1, %s709_s11   ;;  %s524_s4 = sshll.u32 %s713_s12, 8 }
  0x24   : > { %p815_p3 = por %p937_p0, %p54_p12  ;;  %s511_s5 = sshll.u32 %s123_s3, 4 }
  0x25   : > { %s824_s8 = scalar_lea.hbm %s927_s1, %s524_s4  ;;  %s127_s14 = scalar_lea.vmem [#allocation5], %s511_s5 }
  0x26   : > { %s938_s30 = scalar_select %p815_p3, 1, 0 }
  0x27   : > { %s134_s18 = sshll.u32 %s127_s14, 4  ;;  %p826_p11 = pnand %p548_p2, %p56_p13  ;;  %s830_s18 = int_to_ptr.vmem [resolvable:$true] %s134_s18 }
  0x28   : > { %s832_s20 = scalar_lea.sflag [#allocation6], %s123_s3  ;;  %s617_s22 = scalar_lea.hbm %s824_s8, 256 }
  0x29   : > { %p618_p5 = scmp.ne.s32.totalorder %s824_s8, %s617_s22  ;;  %p619_p7 = pneg %p826_p11 }
  0x2a   : > { %s622_s25 = scalar_lea.hbm %s927_s1, 512  ;;  %p623_p10 = scmp.lt.s32.totalorder %s824_s8, %s927_s1 }
  0x2b   : > { %p620_p9 = pnand %p619_p7, %p618_p5  ;;  %p624_p2 = scmp.lt.s32.totalorder %s622_s25, %s617_s22 }
  0x2d   : > { %p621_p12 = pneg %p620_p9  ;;  %p625_p13 = por %p624_p2, %p623_p10 }
  0x2f   : > { %p626_p0 = pnand %p625_p13, %p621_p12 }
  0x31   : > { %629 = shalt.err (!%p626_p0)
}
  0x32   : > { %s630_s28 = scalar_lea.vmem %s830_s18, 256  ;;  %s718_s3 = smov [#allocation5]  }
  0x33   : > { %p631_p1 = scmp.ne.s32.totalorder %s830_s18, %s630_s28  ;;  %s635_s4 = sshll.u32 %s718_s3, 4  ;;  %s636_s4 = int_to_ptr.vmem [resolvable:$false] %s635_s4 }
  0x34   : > { %s637_s5 = scalar_lea.vmem %s636_s4, 512  ;;  %p638_p9 = scmp.lt.s32.totalorder %s830_s18, %s636_s4 }
  0x35   : > { %p633_p6 = pnand %p631_p1, %p619_p7  ;;  %p639_p3 = scmp.lt.s32.totalorder %s637_s5, %s630_s28 }
  0x37   : > { %p634_p5 = pneg %p633_p6  ;;  %p640_p4 = por %p639_p3, %p638_p9 }
  0x39   : > { %p641_p8 = pnand %p640_p4, %p634_p5 }
  0x3b   : > { %644 = shalt.err (!%p641_p8)
}
  0x3c   : > { %s719_s6 = smov 128   ;;  %s720_s7 = smov 8  }
  0x3d   : > { %542 = dma.hbm_to_vmem [thread:$0]  (!%p826_p11), %s824_s8, 256, %s830_s18, %s832_s20, %s719_s6, %s719_s6, %s720_s7  }
  0x3e   : > { %p940_p1 = scmp.ne.s32.totalorder %s935_s17, 0 }
  0x3f   : > { %p941_p6 = scmp.eq.s32.totalorder (!%p940_p1), %s761_s13, 0 }
  0x40   : > { %146 = sbr.rel (%p940_p1) target bundleno = 321 (0x141), region = 28 }
  0x45   : > { %688 = dma.done.wait (%p941_p6), [#allocation3], 8192   ;;  %p942_p7 = pmov %p941_p6 }
  0x46   : > { %s860_s14 = sand.u32 1, %s705_s10   ;;  %p943_p4 = scmp.ne.s32.totalorder %s933_s15, 0 }
  0x47   : > { %690 = vsyncadd (%p942_p7), [#allocation3], 4294959104  ;;  %s516_s22 = sshll.u32 %s860_s14, 4  ;;  %s153_s23 = scalar_lea.sflag [#allocation6], %s860_s14 }
  0x48   : > { %s864_s24 = scalar_lea.vmem [#allocation5], %s516_s22 }
  0x49   : > { %692 = dma.done.wait (%p943_p4), %s153_s23, 256  }
  0x4a   : > { %694 = vsyncadd (%p943_p4), %s153_s23, 4294967040  ;;  %v721_v0 = vmov 0.0   ;;  %v242_v1 = vld [vmem:[#allocation2 + $0x1e8] sm:$0xff]  ;;  %v244_v2 = vld [vmem:[#allocation2 + $0x1f8] sm:$0xff]  ;;  %s517_s15 = sshll.u32 %s860_s14, 6  ;;  %s526_s18 = sshll.u32 %s761_s13, 10 }
  0x4b   : > { %309 = vmatprep.mubr.f32.mxu0 %v721_v0  ;;  %386 = vmatprep.mubr.f32.mxu1 %v721_v0  ;;  %v241_v3 = vld [vmem:[#allocation2 + $0x1e0] sm:$0xff]  ;;  %v243_v4 = vld [vmem:[#allocation2 + $0x1f0] sm:$0xff]  ;;  %v238_v5 = vld [vmem:[#allocation2 + $0x1c8] sm:$0xff]  ;;  %s176_s17 = scalar_lea.vmem [#allocation7], %s517_s15  ;;  %s883_s25 = scalar_lea.hbm %s928_s2, %s526_s18 }
  0x4c   : > { %245 = vmatprep.subr.mxu0 %v242_v1  ;;  %322 = vmatprep.subr.mxu1 %v244_v2  ;;  %v240_v6 = vld [vmem:[#allocation2 + $0x1d8] sm:$0xff]  ;;  %v237_v7 = vld [vmem:[#allocation2 + $0x1c0] sm:$0xff]  ;;  %v239_v8 = vld [vmem:[#allocation2 + $0x1d0] sm:$0xff]  ;;  %s422_s8 = sshll.u32 %s176_s17, 4  ;;  %s408_s13 = scalar_lea.sflag [#allocation4], %s860_s14  ;;  %s878_s8 = int_to_ptr.vmem [resolvable:$true] %s422_s8 }
  0x4d   : > { %246 = vmatpush1.msra.mxu0 %v241_v3  ;;  %323 = vmatpush1.msra.mxu1 %v243_v4  ;;  %v234_v9 = vld [vmem:[#allocation2 + $0x1a8] sm:$0xff]  ;;  %v236_v10 = vld [vmem:[#allocation2 + $0x1b8] sm:$0xff]  ;;  %v233_v11 = vld [vmem:[#allocation2 + $0x1a0] sm:$0xff]  ;;  %s645_s26 = scalar_lea.vmem %s878_s8, 1024  ;;  %p944_p3 = scmp.ne.s32.totalorder %s938_s30, 0 }
  0x4e   : > { %247 = vmatprep.subr.mxu0 %v238_v5  ;;  %324 = vmatprep.subr.mxu1 %v240_v6  ;;  %v235_v12 = vld [vmem:[#allocation2 + $0x1b0] sm:$0xff]  ;;  %v230_v13 = vld [vmem:[#allocation2 + $0x188] sm:$0xff]  ;;  %v232_v14 = vld [vmem:[#allocation2 + $0x198] sm:$0xff]  ;;  %p646_p8 = scmp.ne.s32.totalorder %s878_s8, %s645_s26  ;;  %s722_s27 = smov [#allocation7]  }
  0x4f   : > { %248 = vmatpush1.msra.mxu0 %v237_v7  ;;  %325 = vmatpush1.msra.mxu1 %v239_v8  ;;  %v229_v15 = vld [vmem:[#allocation2 + $0x180] sm:$0xff]  ;;  %v231_v16 = vld [vmem:[#allocation2 + $0x190] sm:$0xff]  ;;  %v226_v17 = vld [vmem:[#allocation2 + $0x168] sm:$0xff]  ;;  %s649_s28 = sshll.u32 %s722_s27, 4  ;;  %s650_s28 = int_to_ptr.vmem [resolvable:$false] %s649_s28 }
  0x50   : > { %249 = vmatprep.subr.mxu0 %v234_v9  ;;  %326 = vmatprep.subr.mxu1 %v236_v10  ;;  %v228_v18 = vld [vmem:[#allocation2 + $0x178] sm:$0xff]  ;;  %v225_v19 = vld [vmem:[#allocation2 + $0x160] sm:$0xff]  ;;  %v227_v20 = vld [vmem:[#allocation2 + $0x170] sm:$0xff]  ;;  %p647_p11 = pnand %p646_p8, %p944_p3  ;;  %s651_s3 = scalar_lea.vmem %s650_s28, 2048 }
  0x51   : > { %250 = vmatpush1.msra.mxu0 %v233_v11  ;;  %327 = vmatpush1.msra.mxu1 %v235_v12  ;;  %v222_v21 = vld [vmem:[#allocation2 + $0x148] sm:$0xff]  ;;  %v224_v22 = vld [vmem:[#allocation2 + $0x158] sm:$0xff]  ;;  %v221_v23 = vld [vmem:[#allocation2 + $0x140] sm:$0xff]  ;;  %p652_p10 = scmp.lt.s32.totalorder %s878_s8, %s650_s28  ;;  %p653_p2 = scmp.lt.s32.totalorder %s651_s3, %s645_s26 }
  0x52   : > { %251 = vmatprep.subr.mxu0 %v230_v13  ;;  %328 = vmatprep.subr.mxu1 %v232_v14  ;;  %v223_v24 = vld [vmem:[#allocation2 + $0x150] sm:$0xff]  ;;  %v218_v25 = vld [vmem:[#allocation2 + $0x128] sm:$0xff]  ;;  %v220_v26 = vld [vmem:[#allocation2 + $0x138] sm:$0xff]  ;;  %p648_p12 = pneg %p647_p11 }
  0x53   : > { %252 = vmatpush1.msra.mxu0 %v229_v15  ;;  %329 = vmatpush1.msra.mxu1 %v231_v16  ;;  %v217_v27 = vld [vmem:[#allocation2 + $0x120] sm:$0xff]  ;;  %v219_v28 = vld [vmem:[#allocation2 + $0x130] sm:$0xff]  ;;  %v214_v29 = vld [vmem:[#allocation2 + $0x108] sm:$0xff]  ;;  %p654_p13 = por %p653_p2, %p652_p10 }
  0x54   : > { %253 = vmatprep.subr.mxu0 %v226_v17  ;;  %330 = vmatprep.subr.mxu1 %v228_v18  ;;  %v216_v30 = vld [vmem:[#allocation2 + $0x118] sm:$0xff]  ;;  %v213_v31 = vld [vmem:[#allocation2 + $0x100] sm:$0xff]  ;;  %v215_v32 = vld [vmem:[#allocation2 + $0x110] sm:$0xff] }
  0x55   : > { %254 = vmatpush1.msra.mxu0 %v225_v19  ;;  %331 = vmatpush1.msra.mxu1 %v227_v20  ;;  %v210_v33 = vld [vmem:[#allocation2 + $0xe8] sm:$0xff]  ;;  %v212_v34 = vld [vmem:[#allocation2 + $0xf8] sm:$0xff]  ;;  %v209_v35 = vld [vmem:[#allocation2 + $0xe0] sm:$0xff]  ;;  %p655_p0 = pnand %p654_p13, %p648_p12 }
  0x56   : > { %255 = vmatprep.subr.mxu0 %v222_v21  ;;  %332 = vmatprep.subr.mxu1 %v224_v22  ;;  %v211_v36 = vld [vmem:[#allocation2 + $0xf0] sm:$0xff]  ;;  %v206_v37 = vld [vmem:[#allocation2 + $0xc8] sm:$0xff]  ;;  %v208_v38 = vld [vmem:[#allocation2 + $0xd8] sm:$0xff] }
  0x57   : > { %256 = vmatpush1.msra.mxu0 %v221_v23  ;;  %333 = vmatpush1.msra.mxu1 %v223_v24  ;;  %v205_v39 = vld [vmem:[#allocation2 + $0xc0] sm:$0xff]  ;;  %v207_v40 = vld [vmem:[#allocation2 + $0xd0] sm:$0xff]  ;;  %v202_v41 = vld [vmem:[#allocation2 + $0xa8] sm:$0xff] }
  0x58   : > { %257 = vmatprep.subr.mxu0 %v218_v25  ;;  %334 = vmatprep.subr.mxu1 %v220_v26  ;;  %v204_v42 = vld [vmem:[#allocation2 + $0xb8] sm:$0xff]  ;;  %v201_v43 = vld [vmem:[#allocation2 + $0xa0] sm:$0xff]  ;;  %v203_v44 = vld [vmem:[#allocation2 + $0xb0] sm:$0xff] }
  0x59   : > { %258 = vmatpush1.msra.mxu0 %v217_v27  ;;  %335 = vmatpush1.msra.mxu1 %v219_v28  ;;  %v198_v45 = vld [vmem:[#allocation2 + $0x88] sm:$0xff]  ;;  %v200_v46 = vld [vmem:[#allocation2 + $0x98] sm:$0xff]  ;;  %v197_v47 = vld [vmem:[#allocation2 + $0x80] sm:$0xff] }
  0x5a   : > { %259 = vmatprep.subr.mxu0 %v214_v29  ;;  %336 = vmatprep.subr.mxu1 %v216_v30  ;;  %v199_v48 = vld [vmem:[#allocation2 + $0x90] sm:$0xff]  ;;  %v194_v49 = vld [vmem:[#allocation2 + $0x68] sm:$0xff]  ;;  %v196_v50 = vld [vmem:[#allocation2 + $0x78] sm:$0xff] }
  0x5b   : > { %260 = vmatpush1.msra.mxu0 %v213_v31  ;;  %337 = vmatpush1.msra.mxu1 %v215_v32  ;;  %v193_v51 = vld [vmem:[#allocation2 + $0x60] sm:$0xff]  ;;  %v195_v52 = vld [vmem:[#allocation2 + $0x70] sm:$0xff]  ;;  %v190_v53 = vld [vmem:[#allocation2 + $0x48] sm:$0xff] }
  0x5c   : > { %261 = vmatprep.subr.mxu0 %v210_v33  ;;  %338 = vmatprep.subr.mxu1 %v212_v34  ;;  %v192_v54 = vld [vmem:[#allocation2 + $0x58] sm:$0xff]  ;;  %v189_v55 = vld [vmem:[#allocation2 + $0x40] sm:$0xff]  ;;  %v191_v56 = vld [vmem:[#allocation2 + $0x50] sm:$0xff] }
  0x5d   : > { %262 = vmatpush1.msra.mxu0 %v209_v35  ;;  %339 = vmatpush1.msra.mxu1 %v211_v36  ;;  %v186_v57 = vld [vmem:[#allocation2 + $0x28] sm:$0xff]  ;;  %v188_v58 = vld [vmem:[#allocation2 + $0x38] sm:$0xff]  ;;  %v185_v59 = vld [vmem:[#allocation2 + $0x20] sm:$0xff] }
  0x5e   : > { %263 = vmatprep.subr.mxu0 %v206_v37  ;;  %340 = vmatprep.subr.mxu1 %v208_v38  ;;  %v187_v60 = vld [vmem:[#allocation2 + $0x30] sm:$0xff]  ;;  %v182_v61 = vld [vmem:[#allocation2 + $0x8] sm:$0xff]  ;;  %v184_v62 = vld [vmem:[#allocation2 + $0x18] sm:$0xff] }
  0x5f   : > { %264 = vmatpush1.msra.mxu0 %v205_v39  ;;  %341 = vmatpush1.msra.mxu1 %v207_v40  ;;  %v181_v63 = vld [vmem:[#allocation2] sm:$0xff]  ;;  %v183_v1 = vld [vmem:[#allocation2 + $0x10] sm:$0xff]  ;;  %v180_v3 = vld [vmem:[%s864_s24 + $0x8] sm:$0xff] }
  0x60   : > { %265 = vmatprep.subr.mxu0 %v202_v41  ;;  %342 = vmatprep.subr.mxu1 %v204_v42  ;;  %v179_v2 = vld [vmem:[%s864_s24] sm:$0xff] }
  0x61   : > { %266 = vmatpush1.msra.mxu0 %v201_v43  ;;  %343 = vmatpush1.msra.mxu1 %v203_v44 }
  0x62   : > { %267 = vmatprep.subr.mxu0 %v198_v45  ;;  %344 = vmatprep.subr.mxu1 %v200_v46 }
  0x63   : > { %268 = vmatpush1.msra.mxu0 %v197_v47  ;;  %345 = vmatpush1.msra.mxu1 %v199_v48 }
  0x64   : > { %269 = vmatprep.subr.mxu0 %v194_v49  ;;  %346 = vmatprep.subr.mxu1 %v196_v50 }
  0x65   : > { %270 = vmatpush1.msra.mxu0 %v193_v51  ;;  %347 = vmatpush1.msra.mxu1 %v195_v52 }
  0x66   : > { %271 = vmatprep.subr.mxu0 %v190_v53  ;;  %348 = vmatprep.subr.mxu1 %v192_v54 }
  0x67   : > { %272 = vmatpush1.msra.mxu0 %v189_v55  ;;  %349 = vmatpush1.msra.mxu1 %v191_v56 }
  0x68   : > { %273 = vmatprep.subr.mxu0 %v186_v57  ;;  %350 = vmatprep.subr.mxu1 %v188_v58 }
  0x69   : > { %274 = vmatpush1.msra.mxu0 %v185_v59  ;;  %351 = vmatpush1.msra.mxu1 %v187_v60 }
  0x6a   : > { %275 = vmatprep.subr.mxu0 %v182_v61  ;;  %352 = vmatprep.subr.mxu1 %v184_v62 }
  0x6b   : > { %276 = vmatpush1.msra.mxu0 %v181_v63  ;;  %353 = vmatpush1.msra.mxu1 %v183_v1 }
  0x6c   : > { %310 = vmatmul.mubr.f32.vlgmr.msra.gmra.mxu0 %v179_v2  ;;  %387 = vmatmul.mubr.f32.vlgmr.msra.gmra.mxu1 %v179_v2 }
  0x6d   : > { %315 = vmatprep.mubr.f32.mxu0 %v721_v0  ;;  %392 = vmatprep.mubr.f32.mxu1 %v721_v0 }
  0x70   : > { %316 = vmatmul.mubr.f32.gmra.mxu0 %v180_v3  ;;  %393 = vmatmul.mubr.f32.gmra.mxu1 %v180_v3 }
 0x12c   : > { %v311_v4 = vpop.f32.mrf.mxu0  ;;  %v388_v5 = vpop.f32.mrf.mxu1 }
 0x12d   : > { %399 = vst [vmem:[%s176_s17] sm:$0xff] %v311_v4  ;;  %401 = vst [vmem:[%s176_s17 + $0x10] sm:$0xff] %v388_v5 }
 0x12e   : > { %v313_v6 = vpop.f32.mrf.mxu0  ;;  %v390_v7 = vpop.f32.mrf.mxu1 }
 0x12f   : > { %400 = vst [vmem:[%s176_s17 + $0x8] sm:$0xff] %v313_v6  ;;  %402 = vst [vmem:[%s176_s17 + $0x18] sm:$0xff] %v390_v7 }
 0x130   : > { %v317_v0 = vpop.f32.mrf.mxu0  ;;  %v394_v8 = vpop.f32.mrf.mxu1 }
 0x131   : > { %403 = vst [vmem:[%s176_s17 + $0x20] sm:$0xff] %v317_v0  ;;  %405 = vst [vmem:[%s176_s17 + $0x30] sm:$0xff] %v394_v8 }
 0x132   : > { %v319_v9 = vpop.f32.mrf.mxu0  ;;  %v396_v10 = vpop.f32.mrf.mxu1 }
 0x133   : > { %404 = vst [vmem:[%s176_s17 + $0x28] sm:$0xff] %v319_v9  ;;  %406 = vst [vmem:[%s176_s17 + $0x38] sm:$0xff] %v396_v10 }
 0x134   : > { %658 = shalt.err (!%p655_p0)
}
 0x135   : > { %s659_s4 = scalar_lea.hbm %s883_s25, 1024  ;;  %s663_s7 = scalar_lea.hbm %s928_s2, 2048 }
 0x136   : > { %p660_p5 = scmp.ne.s32.totalorder %s883_s25, %s659_s4  ;;  %p664_p6 = scmp.lt.s32.totalorder %s883_s25, %s928_s2 }
 0x137   : > { %p665_p7 = scmp.lt.s32.totalorder %s663_s7, %s659_s4 }
 0x138   : > { %p661_p9 = pnand %p660_p5, %p944_p3 }
 0x139   : > { %p666_p4 = por %p665_p7, %p664_p6 }
 0x13a   : > { %p662_p1 = pneg %p661_p9 }
 0x13c   : > { %p667_p8 = pnand %p666_p4, %p662_p1 }
 0x13e   : > { %670 = shalt.err (!%p667_p8)
}
 0x13f   : > { %s723_s24 = smov 512   ;;  %s724_s15 = smov 32  }
 0x140   : > { %533 = dma.vmem_to_hbm [thread:$0]  (%p944_p3), %s878_s8, 1024, %s883_s25, %s408_s13, %s723_s24, %s723_s24, %s724_s15  }
 0x141 PF: > { %s437_s17 = sand.u32 1, %s701_s9   ;;  %p945_p11 = scmp.ne.s32.totalorder %s934_s16, 0 }
 0x142   : > { %p946_p12 = scmp.ge.s32.totalorder %s713_s12, 2  ;;  %s438_s18 = scalar_lea.sflag [#allocation4], %s437_s17 }
 0x144   : > { %p544_p10 = pnand %p946_p12, %p945_p11 }
 0x146   : > { %p545_p2 = pneg %p544_p10 }
 0x148   : > { %696 = dma.done.wait (%p545_p2), %s438_s18, 1024  }
 0x149   : > { %698 = vsyncadd (%p545_p2), %s438_s18, 4294966272  ;;  %p16_p13 = scmp.ge.s32.totalorder %s794_s21, 4   ;;  %s947_s9 = smov %s705_s10 }
 0x14a   : > { %s948_s10 = smov %s709_s11  ;;  %s949_s11 = smov %s811_s29 }
 0x14b   : > { %s950_s12 = smov %s794_s21  ;;  %18 = sbr.rel (!%p16_p13) target bundleno = 6 (0x6), region = 78 }
 0x150   :  { %443 = vsyncpa [#allocation3], 1 }
 0x151   :  { %445 = vsyncpa [#allocation3 + $0x1], 1 }
 0x152   :  { %446 = vsyncpa [#allocation6], 1 }
 0x153   :  { %448 = vsyncpa [#allocation6 + $0x1], 1 }
 0x154   :  { %449 = vsyncpa [#allocation4], 1 }
 0x155   :  { %451 = vsyncpa [#allocation4 + $0x1], 1 }

</bundles_post_ra>
